<compile_context>
chip_gen: v7x
topology: tpu7x:2x2x1
jax: 0.10.0
libtpu: 0.0.40
codegen_flags: <defaults>
</compile_context>

<pallas_src>
import functools
import math

import jax
import jax.numpy as jnp
from jax.experimental import pallas as pl
from jax.experimental.pallas import tpu as pltpu


# ---------------------------------------------------------------------------
# Kernel 1: per-node MLP   y = (dropout(x) @ W1 + b1).relu() * m2 @ W2 + b2
# ---------------------------------------------------------------------------
def _mlp_kernel(x_ref, m1_ref, m2_ref, w1_ref, b1_ref, w2_ref, b2_ref, y_ref):
    x = x_ref[...] * m1_ref[...]                                   # dropout(x)
    h = jnp.dot(x, w1_ref[...], preferred_element_type=jnp.float32) + b1_ref[...]
    h = jnp.maximum(h, 0.0)                                        # relu
    h = h * m2_ref[...]                                            # dropout(h)
    y = jnp.dot(h, w2_ref[...], preferred_element_type=jnp.float32) + b2_ref[...]
    y_ref[...] = y


# ---------------------------------------------------------------------------
# Kernel 2: tiled dense propagation   out = P @ v   (accumulate over k tiles)
# ---------------------------------------------------------------------------
def _prop_kernel(p_ref, v_ref, o_ref, acc_ref):
    @pl.when(pl.program_id(1) == 0)
    def _():
        acc_ref[...] = jnp.zeros_like(acc_ref)

    acc_ref[...] += jnp.dot(p_ref[...], v_ref[...],
                            preferred_element_type=jnp.float32)

    @pl.when(pl.program_id(1) == pl.num_programs(1) - 1)
    def _():
        o_ref[...] = acc_ref[...].astype(o_ref.dtype)


# ---------------------------------------------------------------------------
# Kernel 3: propagation fused with EvenProp combine   out = t0*base + t1*(P@v)
# ---------------------------------------------------------------------------
def _prop_combine_kernel(p_ref, v_ref, base_ref, o_ref, acc_ref, *, t0, t1):
    @pl.when(pl.program_id(1) == 0)
    def _():
        acc_ref[...] = jnp.zeros_like(acc_ref)

    acc_ref[...] += jnp.dot(p_ref[...], v_ref[...],
                            preferred_element_type=jnp.float32)

    @pl.when(pl.program_id(1) == pl.num_programs(1) - 1)
    def _():
        o_ref[...] = (jnp.float32(t0) * base_ref[...]
                      + jnp.float32(t1) * acc_ref[...]).astype(o_ref.dtype)


# ---------------------------------------------------------------------------
# Wrappers
# ---------------------------------------------------------------------------
def _round_up(x, m):
    return (x + m - 1) // m * m


def _pad2d(a, rows, cols):
    pr, pc = rows - a.shape[0], cols - a.shape[1]
    if pr or pc:
        a = jnp.pad(a, ((0, pr), (0, pc)))
    return a


def _mlp_forward(x, m1, m2, W1, b1, W2, b2, *, tile_m):
    n, f_in = x.shape
    f_hid = W1.shape[1]
    f_out = W2.shape[1]
    row = lambda i: (i, 0)
    fixed = lambda i: (0, 0)
    return pl.pallas_call(
        _mlp_kernel,
        out_shape=jax.ShapeDtypeStruct((n, f_out), jnp.float32),
        grid=(n // tile_m,),
        in_specs=[
            pl.BlockSpec((tile_m, f_in), row),     # x tile
            pl.BlockSpec((tile_m, f_in), row),     # dropout mask 1
            pl.BlockSpec((tile_m, f_hid), row),    # dropout mask 2
            pl.BlockSpec((f_in, f_hid), fixed),    # W1 (resident)
            pl.BlockSpec((1, f_hid), fixed),       # b1
            pl.BlockSpec((f_hid, f_out), fixed),   # W2 (resident)
            pl.BlockSpec((1, f_out), fixed),       # b2
        ],
        out_specs=pl.BlockSpec((tile_m, f_out), row),
        compiler_params=pltpu.CompilerParams(
            dimension_semantics=("parallel",)),
    )(x, m1, m2, W1, b1, W2, b2)


def _propagate(P_bf16, v, *, tile_m, tile_k, base=None, t0=None, t1=None):
    n = P_bf16.shape[0]
    f = v.shape[1]
    v_bf16 = v.astype(jnp.bfloat16)

    p_spec = pl.BlockSpec((tile_m, tile_k), lambda i, k: (i, k))
    v_spec = pl.BlockSpec((tile_k, f), lambda i, k: (k, 0))
    o_spec = pl.BlockSpec((tile_m, f), lambda i, k: (i, 0))
    scratch = [pltpu.VMEM((tile_m, f), jnp.float32)]
    cp = pltpu.CompilerParams(dimension_semantics=("parallel", "arbitrary"))
    grid = (n // tile_m, n // tile_k)

    if base is None:
        return pl.pallas_call(
            _prop_kernel,
            out_shape=jax.ShapeDtypeStruct((n, f), jnp.float32),
            grid=grid,
            in_specs=[p_spec, v_spec],
            out_specs=o_spec,
            scratch_shapes=scratch,
            compiler_params=cp,
        )(P_bf16, v_bf16)

    kernel = functools.partial(_prop_combine_kernel, t0=float(t0), t1=float(t1))
    base_spec = pl.BlockSpec((tile_m, f), lambda i, k: (i, 0))
    return pl.pallas_call(
        kernel,
        out_shape=jax.ShapeDtypeStruct((n, f), jnp.float32),
        grid=grid,
        in_specs=[p_spec, v_spec, base_spec],
        out_specs=o_spec,
        scratch_shapes=scratch,
        compiler_params=cp,
    )(P_bf16, v_bf16, base)


def event_encoder(x, P, W1, b1, W2, b2, *, K, alpha, dropout_p, key,
                  training=True, tile_m=128, tile_k=128):
    """Event_Encoder.forward.  W1:(hgcn_dim,hidden_dim), W2:(hidden_dim,hgcn_dim)
    are the transposes of the PyTorch Linear weights; P is the dense
    sym-normalized propagation matrix (I - L_sym)."""
    N, f_in = x.shape
    f_hid = W1.shape[1]
    f_out = W2.shape[1]

    # EvenProp coefficients (non-trainable buffer): temp[k] = alpha*(1-alpha)^(2k)
    t0 = float(alpha)
    t1 = float(alpha) * (1.0 - float(alpha)) ** 2

    # Dropout masks (inverted dropout, precomputed outside the kernel).
    if training and dropout_p > 0.0:
        k1, k2 = jax.random.split(key)
        scale = 1.0 / (1.0 - dropout_p) if dropout_p < 1.0 else 0.0
        m1 = jax.random.bernoulli(k1, 1.0 - dropout_p, (N, f_in)).astype(jnp.float32) * scale
        m2 = jax.random.bernoulli(k2, 1.0 - dropout_p, (N, f_hid)).astype(jnp.float32) * scale
    else:
        m1 = jnp.ones((N, f_in), jnp.float32)
        m2 = jnp.ones((N, f_hid), jnp.float32)

    # Lane-dense padding: features to multiples of 128, nodes to tile multiple.
    LANE = 128
    Np = _round_up(N, math.lcm(tile_m, tile_k))
    f_in_p, f_hid_p, f_out_p = (_round_up(d, LANE) for d in (f_in, f_hid, f_out))

    xp = _pad2d(x.astype(jnp.float32), Np, f_in_p)
    m1p = _pad2d(m1, Np, f_in_p)
    m2p = _pad2d(m2, Np, f_hid_p)
    W1p = _pad2d(W1.astype(jnp.float32), f_in_p, f_hid_p)
    W2p = _pad2d(W2.astype(jnp.float32), f_hid_p, f_out_p)
    b1p = _pad2d(b1.reshape(1, -1).astype(jnp.float32), 1, f_hid_p)
    b2p = _pad2d(b2.reshape(1, -1).astype(jnp.float32), 1, f_out_p)
    Pp = _pad2d(P.astype(jnp.float32), Np, Np).astype(jnp.bfloat16)

    # Per-node MLP.
    y = _mlp_forward(xp, m1p, m2p, W1p, b1p, W2p, b2p, tile_m=tile_m)

    # EvenProp: hidden = t0*y; x <- P@(P@y); hidden += t1*x  (single iteration).
    if K >= 2:
        z1 = _propagate(Pp, y, tile_m=tile_m, tile_k=tile_k)
        out = _propagate(Pp, z1, tile_m=tile_m, tile_k=tile_k,
                         base=y, t0=t0, t1=t1)
    else:
        out = t0 * y  # loop body never executes when K < 2
    return out[:N, :f_out]


# ---------------------------------------------------------------------------
# Pure-JAX reference (no dropout) for correctness check.
# ---------------------------------------------------------------------------
def _ref_forward(x, P, W1, b1, W2, b2, *, alpha):
    h = jnp.maximum(x @ W1 + b1[None, :], 0.0)
    y = h @ W2 + b2[None, :]
    t0 = alpha
    t1 = alpha * (1.0 - alpha) ** 2
    return t0 * y + t1 * (P @ (P @ y))


if __name__ == "__main__":
    # Small but lane-dense shapes (multiples of 128 keep the MXU/store path dense).
    N, hgcn_dim, hidden_dim = 256, 128, 128
    K, alpha, dropout_p = 10, 0.1, 0.5

    root = jax.random.PRNGKey(0)
    k_x, k_adj, k_w1, k_b1, k_w2, k_b2, k_drop = jax.random.split(root, 7)

    x = jax.random.normal(k_x, (N, hgcn_dim), dtype=jnp.float32)

    # Random undirected graph (no self loops) -> dense sym-normalized
    # propagation matrix P = D^{-1/2} A D^{-1/2} (== I - L_sym), the matrix
    # EvenProp effectively propagates with.
    A = (jax.random.uniform(k_adj, (N, N)) < 0.05).astype(jnp.float32)
    A = jnp.triu(A, k=1)
    A = A + A.T
    deg = jnp.sum(A, axis=1)
    dinv = 1.0 / jnp.sqrt(jnp.maximum(deg, 1e-12))
    dinv = jnp.where(deg > 0, dinv, 0.0)
    P = dinv[:, None] * A * dinv[None, :]

    # Linear params (stored as (in, out) = transpose of PyTorch Linear weight).
    def lin_init(kw, kb, fan_in, fan_out):
        bound = 1.0 / (fan_in ** 0.5)
        W = jax.random.uniform(kw, (fan_in, fan_out), minval=-bound, maxval=bound)
        b = jax.random.uniform(kb, (fan_out,), minval=-bound, maxval=bound)
        return W.astype(jnp.float32), b.astype(jnp.float32)

    W1, b1 = lin_init(k_w1, k_b1, hgcn_dim, hidden_dim)   # lin1
    W2, b2 = lin_init(k_w2, k_b2, hidden_dim, hgcn_dim)   # lin2

    # Correctness: deterministic path (training=False => dropout disabled).
    out_eval = event_encoder(x, P, W1, b1, W2, b2, K=K, alpha=alpha,
                             dropout_p=dropout_p, key=k_drop, training=False)
    ref = _ref_forward(x, P, W1, b1, W2, b2, alpha=alpha)
    assert out_eval.shape == (N, hgcn_dim)
    assert jnp.allclose(out_eval, ref, atol=1e-2, rtol=1e-2), "mismatch vs reference"

    # Full training forward (dropout active), as in the PyTorch module.
    out_train = event_encoder(x, P, W1, b1, W2, b2, K=K, alpha=alpha,
                              dropout_p=dropout_p, key=k_drop, training=True)
    jax.block_until_ready(out_train)
    assert out_train.shape == (N, hgcn_dim)
    assert bool(jnp.all(jnp.isfinite(out_train)))
    print("KERNEL_OK")
</pallas_src>

<mosaic_0001>
module attributes {stable_mosaic.version = 11 : i64} {
  func.func @_mlp_kernel(%arg0: i32, %arg1: memref<128x128xf32, #tpu.memory_space<vmem>>, %arg2: memref<128x128xf32, #tpu.memory_space<vmem>>, %arg3: memref<128x128xf32, #tpu.memory_space<vmem>>, %arg4: memref<128x128xf32, #tpu.memory_space<vmem>>, %arg5: memref<1x128xf32, #tpu.memory_space<vmem>>, %arg6: memref<128x128xf32, #tpu.memory_space<vmem>>, %arg7: memref<1x128xf32, #tpu.memory_space<vmem>>, %arg8: memref<128x128xf32, #tpu.memory_space<vmem>>) attributes {dimension_semantics = [#tpu.dimension_semantics<parallel>], iteration_bounds = array<i64: 2>, scalar_prefetch = 0 : i64, scratch_operands = 0 : i64, tpu.core_type = #tpu.core_type<tc>, window_params = [{transform_indices = @transform_0, window_bounds = array<i64: 128, 128>}, {transform_indices = @transform_1, window_bounds = array<i64: 128, 128>}, {transform_indices = @transform_2, window_bounds = array<i64: 128, 128>}, {pipeline_mode = #tpu.pipeline_mode<synchronous>, transform_indices = @transform_3, window_bounds = array<i64: 128, 128>}, {pipeline_mode = #tpu.pipeline_mode<synchronous>, transform_indices = @transform_4, window_bounds = array<i64: 1, 128>}, {pipeline_mode = #tpu.pipeline_mode<synchronous>, transform_indices = @transform_5, window_bounds = array<i64: 128, 128>}, {pipeline_mode = #tpu.pipeline_mode<synchronous>, transform_indices = @transform_6, window_bounds = array<i64: 1, 128>}, {transform_indices = @transform_7, window_bounds = array<i64: 128, 128>}]} {
    %c0 = arith.constant 0 : index
    %c0_0 = arith.constant 0 : index
    %0 = vector.load %arg1[%c0, %c0_0] : memref<128x128xf32, #tpu.memory_space<vmem>>, vector<128x128xf32>
    %c0_1 = arith.constant 0 : index
    %c0_2 = arith.constant 0 : index
    %1 = vector.load %arg2[%c0_1, %c0_2] : memref<128x128xf32, #tpu.memory_space<vmem>>, vector<128x128xf32>
    %2 = arith.mulf %0, %1 : vector<128x128xf32>
    %c0_3 = arith.constant 0 : index
    %c0_4 = arith.constant 0 : index
    %3 = vector.load %arg4[%c0_3, %c0_4] : memref<128x128xf32, #tpu.memory_space<vmem>>, vector<128x128xf32>
    %cst = arith.constant dense<0.000000e+00> : vector<128x128xf32>
    %4 = tpu.matmul %2, %3, %cst {dimension_numbers = #tpu.dot_dimension_numbers<[1], [0], [0], [1], [0, 0, 1, 1], [], []>} : vector<128x128xf32>, vector<128x128xf32>, vector<128x128xf32> -> vector<128x128xf32>
    %c0_5 = arith.constant 0 : index
    %c0_6 = arith.constant 0 : index
    %5 = vector.load %arg5[%c0_5, %c0_6] : memref<1x128xf32, #tpu.memory_space<vmem>>, vector<1x128xf32>
    %6 = vector.broadcast %5 : vector<1x128xf32> to vector<128x128xf32>
    %7 = arith.addf %4, %6 : vector<128x128xf32>
    %cst_7 = arith.constant 0.000000e+00 : f32
    %8 = vector.broadcast %cst_7 : f32 to vector<128x128xf32>
    %9 = arith.maximumf %7, %8 : vector<128x128xf32>
    %c0_8 = arith.constant 0 : index
    %c0_9 = arith.constant 0 : index
    %10 = vector.load %arg3[%c0_8, %c0_9] : memref<128x128xf32, #tpu.memory_space<vmem>>, vector<128x128xf32>
    %11 = arith.mulf %9, %10 : vector<128x128xf32>
    %c0_10 = arith.constant 0 : index
    %c0_11 = arith.constant 0 : index
    %12 = vector.load %arg6[%c0_10, %c0_11] : memref<128x128xf32, #tpu.memory_space<vmem>>, vector<128x128xf32>
    %cst_12 = arith.constant dense<0.000000e+00> : vector<128x128xf32>
    %13 = tpu.matmul %11, %12, %cst_12 {dimension_numbers = #tpu.dot_dimension_numbers<[1], [0], [0], [1], [0, 0, 1, 1], [], []>} : vector<128x128xf32>, vector<128x128xf32>, vector<128x128xf32> -> vector<128x128xf32>
    %c0_13 = arith.constant 0 : index
    %c0_14 = arith.constant 0 : index
    %14 = vector.load %arg7[%c0_13, %c0_14] : memref<1x128xf32, #tpu.memory_space<vmem>>, vector<1x128xf32>
    %15 = vector.broadcast %14 : vector<1x128xf32> to vector<128x128xf32>
    %16 = arith.addf %13, %15 : vector<128x128xf32>
    %c0_15 = arith.constant 0 : index
    %c0_16 = arith.constant 0 : index
    %17 = vector.load %arg8[%c0_15, %c0_16] : memref<128x128xf32, #tpu.memory_space<vmem>>, vector<128x128xf32>
    tpu.vector_store %arg8[%c0_15, %c0_16], %16 {strides = array<i32>} : memref<128x128xf32, #tpu.memory_space<vmem>>, vector<128x128xf32>,
    return
  }
  func.func @transform_0(%arg0: i32) -> (i32, i32) {
    %c0_i32 = arith.constant 0 : i32
    %c0_i32_0 = arith.constant 0 : i32
    return %arg0, %c0_i32 : i32, i32
  }
  func.func @transform_1(%arg0: i32) -> (i32, i32) {
    %c0_i32 = arith.constant 0 : i32
    %c0_i32_0 = arith.constant 0 : i32
    return %arg0, %c0_i32 : i32, i32
  }
  func.func @transform_2(%arg0: i32) -> (i32, i32) {
    %c0_i32 = arith.constant 0 : i32
    %c0_i32_0 = arith.constant 0 : i32
    return %arg0, %c0_i32 : i32, i32
  }
  func.func @transform_3(%arg0: i32) -> (i32, i32) {
    %c0_i32 = arith.constant 0 : i32
    %c0_i32_0 = arith.constant 0 : i32
    %c0_i32_1 = arith.constant 0 : i32
    return %c0_i32, %c0_i32_0 : i32, i32
  }
  func.func @transform_4(%arg0: i32) -> (i32, i32) {
    %c0_i32 = arith.constant 0 : i32
    %c0_i32_0 = arith.constant 0 : i32
    %c0_i32_1 = arith.constant 0 : i32
    return %c0_i32, %c0_i32_0 : i32, i32
  }
  func.func @transform_5(%arg0: i32) -> (i32, i32) {
    %c0_i32 = arith.constant 0 : i32
    %c0_i32_0 = arith.constant 0 : i32
    %c0_i32_1 = arith.constant 0 : i32
    return %c0_i32, %c0_i32_0 : i32, i32
  }
  func.func @transform_6(%arg0: i32) -> (i32, i32) {
    %c0_i32 = arith.constant 0 : i32
    %c0_i32_0 = arith.constant 0 : i32
    %c0_i32_1 = arith.constant 0 : i32
    return %c0_i32, %c0_i32_0 : i32, i32
  }
  func.func @transform_7(%arg0: i32) -> (i32, i32) {
    %c0_i32 = arith.constant 0 : i32
    %c0_i32_0 = arith.constant 0 : i32
    return %arg0, %c0_i32 : i32, i32
  }
}

</mosaic_0001>

<bundles_post_ra>
// kernel: tpu_custom_call.1
= control target key start
LH: loop header
LB: loop body
LE: loop exit
PB: predicated region body
PF: predicated region fallthrough
CT: control target
= control target key end

     0   :  { %s2055_s0 = inlined_call_operand.hbm [shape: f32[256,128], index: 0, kind: input, shape index: {}]   ;;  %s2056_s1 = inlined_call_operand.hbm [shape: f32[256,128], index: 1, kind: input, shape index: {}]   ;;  %s2057_s2 = inlined_call_operand.hbm [shape: f32[256,128], index: 2, kind: input, shape index: {}]   ;;  %s2058_s3 = inlined_call_operand.hbm [shape: f32[128,128], index: 3, kind: input, shape index: {}]   ;;  %s2059_s4 = inlined_call_operand.vmem [shape: f32[1,128], index: 4, kind: input, shape index: {}]   ;;  %s2060_s5 = inlined_call_operand.hbm [shape: f32[128,128], index: 5, kind: input, shape index: {}]   ;;  %s2061_s6 = inlined_call_operand.vmem [shape: f32[1,128], index: 6, kind: input, shape index: {}]   ;;  %s2062_s7 = inlined_call_operand.hbm [shape: f32[256,128], index: 7, kind: output, shape index: {}]  }
   0x1   :  { %2084 = sst [smem:[#allocation21_spill]] %s2056_s1 }
   0x2   :  { %2085 = sst [smem:[#allocation22_spill]] %s2058_s3 }
   0x3   :  { %12 = vsyncpa [#allocation3], 0 }
   0x4   :  { %14 = vsyncpa [#allocation3 + $0x1], 0 }
   0x5   :  { %15 = vsyncpa [#allocation6], 0 }
   0x6   :  { %17 = vsyncpa [#allocation6 + $0x1], 0 }
   0x7   :  { %18 = vsyncpa [#allocation9], 0 }
   0x8   :  { %19 = vsyncpa [#allocation4], 0 }
   0x9   :  { %21 = vsyncpa [#allocation4 + $0x1], 0  ;;  %s1629_s24 = smov 0   ;;  %s1631_s25 = smov 0  }
   0xa   :  { %s1633_s26 = smov 0   ;;  %s1635_s27 = smov 0  }
   0xb LB: > { %2086 = sst [smem:[#allocation16_spill]] %s1565_s24  ;;  %s1650_s28 = sadd.s32 4294967295, %s1577_s27   ;;  %s1577_s27 = sphi %s1635_s27, %s2121_s27   ;;  %s1573_s26 = sphi %s1633_s26, %s2125_s26   ;;  %s1569_s25 = sphi %s1631_s25, %s2124_s25   ;;  %s1565_s24 = sphi %s1629_s24, %s2123_s24  }
   0xc   : > { %2087 = sst [smem:[#allocation17_spill]] %s1577_s27  ;;  %s1004_s29 = sadd.s32 4294967294, %s1577_s27  }
   0xd   : > { %s1654_s30 = sadd.s32 1, %s1577_s27   ;;  %s34_s8 = sadd.s32 1, %s1573_s26 }
   0xe   : > { %2088 = sst [smem:[#allocation18_spill]] %s1654_s30  ;;  %s31_s9 = ssub.s32 %s1577_s27, %s1654_s30 }
   0xf   : > { %p41_p0 = scmp.ne.s32.totalorder %s1573_s26, %s1569_s25  ;;  %p32_p1 = scmp.eq.s32.totalorder %s31_s9, 0 }
  0x10   : > { %p42_p2 = scmp.eq.s32.totalorder %s1577_s27, 0  ;;  %p47_p3 = scmp.ne.s32.totalorder %s1569_s25, %s1565_s24 }
  0x11   : > { %p2064_p4 = scmp.eq.s32.totalorder %s1650_s28, 0  ;;  %p207_p7 = scmp.eq.s32.totalorder %s1650_s28, 1 }
  0x12   : > { %s1666_s10 = scalar_select %p32_p1, %s1573_s26, %s34_s8  }
  0x13   : > { %p1668_p5 = por %p42_p2, %p41_p0  ;;  %p1674_p6 = por %p2064_p4, %p47_p3 }
  0x14   : > { %2089 = sst [smem:[#allocation19_spill]] %s1666_s10  ;;  %p213_p8 = scmp.eq.s32.totalorder %s1004_s29, 1 }
  0x15   : > { %s2090_s11 = scalar_select %p1668_p5, 1, 0 }
  0x16   : > { %s2091_s12 = scalar_select %p1674_p6, 1, 0 }
  0x17   : > { %p1005_p9 = scmp.ge.s32.totalorder %s1577_s27, 1  ;;  %p220_p10 = scmp.lt.s32.totalorder %s1577_s27, 3 }
  0x18   : > { %p1681_p11 = por %p207_p7, %p41_p0  ;;  %p1685_p12 = por %p213_p8, %p47_p3 }
  0x19   : > { %p1689_p13 = pnand %p1005_p9, %p220_p10  ;;  %s1579_s16 = smov [#allocation8]  }
  0x1a   : > { %s2092_s13 = scalar_select %p1681_p11, 1, 0 }
  0x1b   : > { %s2093_s14 = scalar_select %p1685_p12, 1, 0 }
  0x1c   : > { %s2095_s15 = scalar_select %p1689_p13, 1, 0 }
  0x1d   : > { %2094 = sst [smem:[#allocation20_spill]] %s2093_s14  ;;  %p1292_p1 = pneg %p1689_p13 }
  0x1e   : > { %s232_s17 = sshll.u32 %s1579_s16, 4  ;;  %s2063_s19 = sand.u32 1, %s1573_s26   ;;  %s233_s17 = int_to_ptr.vmem [resolvable:$true] %s232_s17 }
  0x1f   : > { %p1697_p2 = pnand %p1292_p1, %p2064_p4  ;;  %s1706_s20 = sshll.u32 %s2063_s19, 7 }
  0x20   : > { %s2097_s3 = sld [smem:[#allocation22_spill]] }
  0x21   : > { %s2096_s18 = scalar_select %p1697_p2, 1, 0 }
  0x22   : > { %p2074_p8 = pneg %p1697_p2 }
  0x26   : > { %s1357_s23 = scalar_lea.hbm %s2097_s3, 2048 }
  0x27   : > { %p1358_p7 = scmp.ne.s32.totalorder %s2097_s3, %s1357_s23  ;;  %p1364_p1 = scmp.lt.u32.totalorder %s1357_s23, %s2097_s3 }
  0x29   : > { %p1360_p9 = pnand %p2074_p8, %p1358_p7 }
  0x2b   : > { %p1361_p10 = pneg %p1360_p9 }
  0x2d   : > { %p1366_p0 = pnand %p1364_p1, %p1361_p10 }
  0x2f   : > { %1369 = shalt.err (!%p1366_p0)
}
  0x30   : > { %s1370_s19 = scalar_lea.vmem %s233_s17, 2048  ;;  %p1378_p11 = scmp.lt.s32.totalorder %s233_s17, %s233_s17 }
  0x31   : > { %p1371_p4 = scmp.ne.s32.totalorder %s233_s17, %s1370_s19  ;;  %p1379_p6 = scmp.lt.s32.totalorder %s1370_s19, %s1370_s19 }
  0x33   : > { %p1373_p3 = pnand %p1371_p4, %p2074_p8  ;;  %p1380_p13 = por %p1379_p6, %p1378_p11 }
  0x35   : > { %p1374_p12 = pneg %p1373_p3 }
  0x37   : > { %p1381_p5 = pnand %p1380_p13, %p1374_p12 }
  0x39   : > { %1384 = shalt.err (!%p1381_p5)
}
  0x3a   : > { %s2070_s21 = smov 128   ;;  %s2072_s22 = smov 8  }
  0x3b   : > { %1295 = dma.hbm_to_vmem [thread:$0]  (!%p1697_p2), %s2097_s3, 2048, %s233_s17, [#allocation9], %s2070_s21, %s2070_s21, %s2072_s22  }
  0x3c   : > { %s1734_s19 = sshll.u32 %s1577_s27, 11  ;;  %p2098_p4 = scmp.ne.s32.totalorder %s2090_s11, 0 }
  0x3d   : > { %p2099_p5 = scmp.lt.s32.totalorder %s1577_s27, 2  ;;  %s286_s9 = sand.u32 1, %s1577_s27  }
  0x3e   : > { %s2101_s1 = sld [smem:[#allocation21_spill]]  ;;  %s290_s17 = scalar_lea.vmem [#allocation5], %s1706_s20 }
  0x3f   : > { %p1740_p6 = pnand %p2099_p5, %p2098_p4  ;;  %s297_s23 = sshll.u32 %s290_s17, 4  ;;  %s1752_s23 = int_to_ptr.vmem [resolvable:$true] %s297_s23 }
  0x40   : > { %s1754_s11 = scalar_lea.sflag [#allocation6], %s286_s9 }
  0x41   : > { %s2100_s8 = scalar_select %p1740_p6, 1, 0 }
  0x42   : > { %p1760_p12 = pneg %p1740_p6 }
  0x44   : > { %s1749_s30 = scalar_lea.hbm %s2101_s1, %s1734_s19  ;;  %s1390_s22 = scalar_lea.hbm %s2101_s1, 4096 }
  0x45   : > { %s1385_s29 = scalar_lea.hbm %s1749_s30, 2048  ;;  %p1391_p3 = scmp.lt.u32.totalorder %s1749_s30, %s2101_s1 }
  0x46   : > { %p1386_p11 = scmp.ne.s32.totalorder %s1749_s30, %s1385_s29  ;;  %p1392_p7 = scmp.lt.u32.totalorder %s1390_s22, %s1385_s29 }
  0x47   : > { %s2102_s21 = scalar_select %p1760_p12, 1, 0 }
  0x48   : > { %p1388_p13 = pnand %p1760_p12, %p1386_p11  ;;  %p1393_p9 = por %p1392_p7, %p1391_p3 }
  0x49   : > { %p1394_p10 = scmp.lt.u32.totalorder %s1385_s29, %s1749_s30 }
  0x4a   : > { %p1389_p0 = pneg %p1388_p13 }
  0x4b   : > { %p1395_p1 = por %p1394_p10, %p1393_p9 }
  0x4d   : > { %p1396_p4 = pnand %p1395_p1, %p1389_p0 }
  0x4f   : > { %1399 = shalt.err (!%p1396_p4)
}
  0x50   : > { %s1400_s9 = scalar_lea.vmem %s1752_s23, 2048  ;;  %s1582_s10 = smov [#allocation5]  }
  0x51   : > { %p1401_p5 = scmp.ne.s32.totalorder %s1752_s23, %s1400_s9  ;;  %s1405_s16 = sshll.u32 %s1582_s10, 4  ;;  %s1406_s16 = int_to_ptr.vmem [resolvable:$false] %s1405_s16 }
  0x52   : > { %s1407_s3 = scalar_lea.vmem %s1406_s16, 4096  ;;  %p1408_p8 = scmp.lt.s32.totalorder %s1752_s23, %s1406_s16 }
  0x53   : > { %p1403_p11 = pnand %p1401_p5, %p1760_p12  ;;  %p1409_p2 = scmp.lt.s32.totalorder %s1407_s3, %s1400_s9 }
  0x55   : > { %p1404_p13 = pneg %p1403_p11  ;;  %p1410_p3 = por %p1409_p2, %p1408_p8 }
  0x57   : > { %p1411_p7 = pnand %p1410_p3, %p1404_p13 }
  0x59   : > { %1414 = shalt.err (!%p1411_p7)
}
  0x5a   : > { %s2103_s22 = smov 8   ;;  %s2104_s29 = smov 128  }
  0x5b   : > { %1305 = dma.hbm_to_vmem [thread:$0]  (!%p1740_p6), %s1749_s30, 2048, %s1752_s23, %s1754_s11, %s2104_s29, %s2104_s29, %s2103_s22  }
  0x5c   : > { %s1583_s17 = smov [#allocation10]   ;;  %s1415_s9 = scalar_lea.hbm %s2060_s5, 2048 }
  0x5d   : > { %s248_s1 = sshll.u32 %s1583_s17, 4  ;;  %p1416_p2 = scmp.ne.s32.totalorder %s2060_s5, %s1415_s9  ;;  %s249_s1 = int_to_ptr.vmem [resolvable:$true] %s248_s1 }
  0x5e   : > { %p2105_p8 = scmp.ne.s32.totalorder %s2096_s18, 0  ;;  %p1422_p1 = scmp.lt.u32.totalorder %s1415_s9, %s2060_s5 }
  0x60   : > { %p2106_p0 = pneg %p2105_p8 }
  0x62   : > { %p1418_p9 = pnand %p1416_p2, %p2106_p0 }
  0x64   : > { %p1419_p10 = pneg %p1418_p9 }
  0x66   : > { %p1424_p4 = pnand %p1422_p1, %p1419_p10 }
  0x68   : > { %1427 = shalt.err (!%p1424_p4)
}
  0x69   : > { %s1428_s30 = scalar_lea.vmem %s249_s1, 2048  ;;  %p2107_p11 = pmov %p2106_p0 }
  0x6a   : > { %p1429_p5 = scmp.ne.s32.totalorder %s249_s1, %s1428_s30  ;;  %p1436_p7 = scmp.lt.s32.totalorder %s249_s1, %s249_s1 }
  0x6b   : > { %p1437_p6 = scmp.lt.s32.totalorder %s1428_s30, %s1428_s30 }
  0x6c   : > { %p1431_p13 = pnand %p1429_p5, %p2107_p11 }
  0x6d   : > { %p1438_p12 = por %p1437_p6, %p1436_p7 }
  0x6e   : > { %p1432_p3 = pneg %p1431_p13 }
  0x70   : > { %p1439_p0 = pnand %p1438_p12, %p1432_p3 }
  0x72   : > { %1442 = shalt.err (!%p1439_p0)
}
  0x73   : > { %1298 = dma.hbm_to_vmem [thread:$0]  (!%p2105_p8), %s2060_s5, 2048, %s249_s1, [#allocation9], %s2104_s29, %s2104_s29, %s2103_s22  }
  0x74   : > { %s1814_s17 = scalar_lea.hbm %s2055_s0, %s1734_s19  ;;  %s269_s18 = scalar_lea.vmem [#allocation2], %s1706_s20 }
  0x75   : > { %s276_s10 = sshll.u32 %s269_s18, 4  ;;  %s2108_s9 = sand.u32 1, %s1573_s26   ;;  %s1817_s10 = int_to_ptr.vmem [resolvable:$true] %s276_s10 }
  0x76   : > { %s1821_s16 = scalar_lea.sflag [#allocation3], %s2108_s9  ;;  %s1443_s3 = scalar_lea.hbm %s1814_s17, 2048 }
  0x77   : > { %p1444_p6 = scmp.ne.s32.totalorder %s1814_s17, %s1443_s3  ;;  %p2109_p12 = scmp.ne.s32.totalorder %s2102_s21, 0 }
  0x78   : > { %s1448_s24 = scalar_lea.hbm %s2055_s0, 4096  ;;  %p1449_p9 = scmp.lt.u32.totalorder %s1814_s17, %s2055_s0 }
  0x79   : > { %p1446_p2 = pnand %p1444_p6, %p2109_p12  ;;  %p1450_p10 = scmp.lt.u32.totalorder %s1448_s24, %s1443_s3 }
  0x7a   : > { %p1452_p4 = scmp.lt.u32.totalorder %s1443_s3, %s1814_s17 }
  0x7b   : > { %p1447_p8 = pneg %p1446_p2  ;;  %p1451_p1 = por %p1450_p10, %p1449_p9 }
  0x7d   : > { %p1453_p5 = por %p1452_p4, %p1451_p1 }
  0x7f   : > { %p1454_p11 = pnand %p1453_p5, %p1447_p8 }
  0x81   : > { %1457 = shalt.err (!%p1454_p11)
}
  0x82   : > { %s1458_s23 = scalar_lea.vmem %s1817_s10, 2048  ;;  %s1584_s18 = smov [#allocation2]  }
  0x83   : > { %p1459_p13 = scmp.ne.s32.totalorder %s1817_s10, %s1458_s23  ;;  %s1463_s9 = sshll.u32 %s1584_s18, 4  ;;  %s1464_s9 = int_to_ptr.vmem [resolvable:$false] %s1463_s9 }
  0x84   : > { %s1465_s1 = scalar_lea.vmem %s1464_s9, 4096  ;;  %p1466_p0 = scmp.lt.s32.totalorder %s1817_s10, %s1464_s9 }
  0x85   : > { %p1461_p3 = pnand %p1459_p13, %p2109_p12  ;;  %p1467_p6 = scmp.lt.s32.totalorder %s1465_s1, %s1458_s23 }
  0x87   : > { %p1462_p7 = pneg %p1461_p3  ;;  %p1468_p2 = por %p1467_p6, %p1466_p0 }
  0x89   : > { %p1469_p9 = pnand %p1468_p2, %p1462_p7 }
  0x8b   : > { %1472 = shalt.err (!%p1469_p9)
}
  0x8c   : > { %p2110_p8 = scmp.ne.s32.totalorder %s2100_s8, 0  ;;  %s1852_s24 = scalar_lea.hbm %s2057_s2, %s1734_s19 }
  0x8d   : > { %s311_s27 = scalar_lea.vmem [#allocation7], %s1706_s20  ;;  %s1473_s23 = scalar_lea.hbm %s1852_s24, 2048 }
  0x8e   : > { %1302 = dma.hbm_to_vmem [thread:$0]  (!%p2110_p8), %s1814_s17, 2048, %s1817_s10, %s1821_s16, %s2104_s29, %s2104_s29, %s2103_s22  }
  0x8f   : > { %s318_s14 = sshll.u32 %s311_s27, 4  ;;  %p1474_p10 = scmp.ne.s32.totalorder %s1852_s24, %s1473_s23  ;;  %s1855_s14 = int_to_ptr.vmem [resolvable:$true] %s318_s14 }
  0x90   : > { %s1478_s10 = scalar_lea.hbm %s2057_s2, 4096  ;;  %p1479_p5 = scmp.lt.u32.totalorder %s1852_s24, %s2057_s2 }
  0x91   : > { %p1476_p1 = pnand %p1474_p10, %p2109_p12  ;;  %p1480_p11 = scmp.lt.u32.totalorder %s1478_s10, %s1473_s23 }
  0x92   : > { %p1482_p3 = scmp.lt.u32.totalorder %s1473_s23, %s1852_s24 }
  0x93   : > { %p1477_p4 = pneg %p1476_p1  ;;  %p1481_p13 = por %p1480_p11, %p1479_p5 }
  0x95   : > { %p1483_p7 = por %p1482_p3, %p1481_p13 }
  0x97   : > { %p1484_p0 = pnand %p1483_p7, %p1477_p4 }
  0x99   : > { %1487 = shalt.err (!%p1484_p0)
}
  0x9a   : > { %s1488_s20 = scalar_lea.vmem %s1855_s14, 2048  ;;  %s1585_s9 = smov [#allocation7]  }
  0x9b   : > { %p1489_p6 = scmp.ne.s32.totalorder %s1855_s14, %s1488_s20  ;;  %s1493_s1 = sshll.u32 %s1585_s9, 4  ;;  %s1494_s1 = int_to_ptr.vmem [resolvable:$false] %s1493_s1 }
  0x9c   : > { %s1495_s3 = scalar_lea.vmem %s1494_s1, 4096  ;;  %p1496_p10 = scmp.lt.s32.totalorder %s1855_s14, %s1494_s1 }
  0x9d   : > { %p1491_p2 = pnand %p1489_p6, %p2109_p12  ;;  %p1497_p1 = scmp.lt.s32.totalorder %s1495_s3, %s1488_s20 }
  0x9f   : > { %p1492_p9 = pneg %p1491_p2  ;;  %p1498_p5 = por %p1497_p1, %p1496_p10 }
  0xa1   : > { %p1499_p11 = pnand %p1498_p5, %p1492_p9 }
  0xa3   : > { %1502 = shalt.err (!%p1499_p11)
}
  0xa4   : > { %1308 = dma.hbm_to_vmem [thread:$0]  (!%p2110_p8), %s1852_s24, 2048, %s1855_s14, %s1754_s11, %s2104_s29, %s2104_s29, %s2103_s22  }
  0xa5   : > { %p2111_p12 = scmp.ne.s32.totalorder %s2095_s15, 0 }
  0xa6   : > { %s1885_s21 = sand.u32 (!%p2111_p12), 1, %s1569_s25   ;;  %p2112_p4 = scmp.ne.s32.totalorder (!%p2111_p12), %s2091_s12, 0 }
  0xa7   : > { %330 = sbr.rel (%p2111_p12) target bundleno = 694 (0x2b6), region = 48  ;;  %s1888_s30 = sshll.u32 (!%p2111_p12), %s1885_s21, 7 }
  0xa8   : > { %s333_s8 = scalar_lea.sflag (!%p2111_p12), [#allocation3], %s1885_s21  ;;  %s1892_s27 = scalar_lea.vmem (!%p2111_p12), [#allocation2], %s1888_s30 }
  0xae   : > { %1548 = dma.done.wait (%p2112_p4), %s333_s8, 2048  }
  0xaf   : > { %1550 = vsyncadd (%p2112_p4), %s333_s8, 4294965248  ;;  %s341_s15 = sand.u32 1, %s1650_s28   ;;  %s1900_s22 = scalar_lea.vmem [#allocation5], %s1888_s30 }
  0xb0   : > { %s342_s11 = scalar_lea.sflag [#allocation6], %s341_s15 }
  0xb1   : > { %1552 = dma.done.wait (%p2112_p4), %s342_s11, 4096  }
  0xb2   : > { %1554 = vsyncadd (%p2112_p4), %s342_s11, 4294963200  ;;  %s1907_s29 = scalar_lea.vmem [#allocation7], %s1888_s30  ;;  %p2113_p8 = scmp.eq.s32.totalorder %s1650_s28, 0 }
  0xb4   : > { %1556 = dma.done.wait (%p2113_p8), [#allocation9], 4096   ;;  %p2114_p13 = pmov %p2113_p8 }
  0xb5   : > { %v455_v0 = vld [vmem:[#allocation8] sm:$0xff]  ;;  %v456_v1 = vld [vmem:[#allocation8 + $0x8] sm:$0xff]  ;;  %v457_v2 = vld [vmem:[#allocation8 + $0x10] sm:$0xff]  ;;  %s1986_s18 = scalar_lea.vmem [#allocation11], %s1888_s30  ;;  %s1035_s17 = sshll.u32 %s1650_s28, 11 }
  0xb6   : > { %1558 = vsyncadd (%p2114_p13), [#allocation9], 4294963200  ;;  %v1212_v3 = vpack.c.bf16 %v456_v1, %v455_v0  ;;  %v458_v4 = vld [vmem:[#allocation8 + $0x18] sm:$0xff]  ;;  %v459_v6 = vld [vmem:[#allocation8 + $0x20] sm:$0xff]  ;;  %s869_s10 = sshll.u32 %s1986_s18, 4  ;;  %s2007_s20 = scalar_lea.hbm %s2062_s7, %s1035_s17  ;;  %s2009_s10 = int_to_ptr.vmem [resolvable:$true] %s869_s10 }
  0xb7   : > { %v1216_v5 = vpack.c.bf16 %v458_v4, %v457_v2  ;;  %v460_v7 = vld [vmem:[#allocation8 + $0x28] sm:$0xff]  ;;  %v407_v9 = vld [vmem:[%s1892_s27] sm:$0xff]  ;;  %v461_v11 = vld [vmem:[#allocation8 + $0x30] sm:$0xff]  ;;  %s856_s28 = scalar_lea.sflag [#allocation4], %s1885_s21  ;;  %s1503_s9 = scalar_lea.vmem %s2009_s10, 2048 }
  0xb8   : > { %1213 = vmatprep.subr.bf16.mxu0 %v1212_v3  ;;  %v1220_v8 = vpack.c.bf16 %v460_v7, %v459_v6  ;;  %v423_v10 = vld [vmem:[%s1900_s22] sm:$0xff]  ;;  %v462_v12 = vld [vmem:[#allocation8 + $0x38] sm:$0xff]  ;;  %v464_v16 = vld [vmem:[#allocation8 + $0x48] sm:$0xff]  ;;  %p1504_p3 = scmp.ne.s32.totalorder %s2009_s10, %s1503_s9  ;;  %p2115_p7 = scmp.ne.s32.totalorder %s2092_s13, 0 }
  0xb9   : > { %1215 = vmatpush3.bf16.msra.mxu0 %v1212_v3  ;;  %v439_v13 = vmul.f32 %v423_v10, %v407_v9  ;;  %v1224_v14 = vpack.c.bf16 %v462_v12, %v461_v11  ;;  %v463_v15 = vld [vmem:[#allocation8 + $0x40] sm:$0xff]  ;;  %v465_v18 = vld [vmem:[#allocation8 + $0x50] sm:$0xff]  ;;  %v466_v19 = vld [vmem:[#allocation8 + $0x58] sm:$0xff]  ;;  %s1586_s1 = smov [#allocation11]  }
  0xba   : > { %1217 = vmatprep.subr.bf16.mxu0 %v1216_v5  ;;  %v1228_v17 = vpack.c.bf16 %v464_v16, %v463_v15  ;;  %v671_v20 = vld [vmem:[#allocation10] sm:$0xff]  ;;  %v672_v21 = vld [vmem:[#allocation10 + $0x8] sm:$0xff]  ;;  %v673_v22 = vld [vmem:[#allocation10 + $0x10] sm:$0xff]  ;;  %v1232_v23 = vpack.c.bf16 %v466_v19, %v465_v18  ;;  %p1505_p0 = pnand %p1504_p3, %p2115_p7  ;;  %s1507_s3 = sshll.u32 %s1586_s1, 4  ;;  %s1508_s3 = int_to_ptr.vmem [resolvable:$false] %s1507_s3 }
  0xbb   : > { %1132 = vmatprep.mubr.f32.mxu0 %v439_v13  ;;  %v467_v24 = vld [vmem:[#allocation8 + $0x60] sm:$0xff]  ;;  %v1244_v25 = vpack.c.bf16 %v672_v21, %v671_v20  ;;  %v674_v26 = vld [vmem:[#allocation10 + $0x18] sm:$0xff]  ;;  %v468_v27 = vld [vmem:[#allocation8 + $0x68] sm:$0xff]  ;;  %s1509_s30 = scalar_lea.vmem %s1508_s3, 4096  ;;  %p1510_p2 = scmp.lt.s32.totalorder %s2009_s10, %s1508_s3 }
  0xbc   : > { %v1248_v28 = vpack.c.bf16 %v674_v26, %v673_v22  ;;  %v675_v29 = vld [vmem:[#allocation10 + $0x20] sm:$0xff]  ;;  %v676_v30 = vld [vmem:[#allocation10 + $0x28] sm:$0xff]  ;;  %v1236_v31 = vpack.c.bf16 %v468_v27, %v467_v24  ;;  %v469_v32 = vld [vmem:[#allocation8 + $0x70] sm:$0xff]  ;;  %p1506_p6 = pneg %p1505_p0  ;;  %p1511_p9 = scmp.lt.s32.totalorder %s1509_s30, %s1503_s9 }
  0xbd   : > { %1219 = vmatpush3.bf16.msra.mxu0 %v1216_v5  ;;  %1245 = vmatprep.subr.bf16.mxu1 %v1244_v25  ;;  %v1252_v33 = vpack.c.bf16 %v676_v30, %v675_v29  ;;  %v470_v34 = vld [vmem:[#allocation8 + $0x78] sm:$0xff]  ;;  %v677_v35 = vld [vmem:[#allocation10 + $0x30] sm:$0xff]  ;;  %v679_v39 = vld [vmem:[#allocation10 + $0x40] sm:$0xff] }
  0xbe   : > { %1221 = vmatprep.subr.bf16.mxu0 %v1220_v8  ;;  %1247 = vmatpush3.bf16.msra.mxu1 %v1244_v25  ;;  %v678_v36 = vld [vmem:[#allocation10 + $0x38] sm:$0xff]  ;;  %v1240_v37 = vpack.c.bf16 %v470_v34, %v469_v32  ;;  %v680_v40 = vld [vmem:[#allocation10 + $0x48] sm:$0xff]  ;;  %v409_v43 = vld [vmem:[%s1892_s27 + $0x10] sm:$0xff]  ;;  %p1512_p10 = por %p1511_p9, %p1510_p2 }
  0xbf   : > { %1249 = vmatprep.subr.bf16.mxu1 %v1248_v28  ;;  %v1256_v38 = vpack.c.bf16 %v678_v36, %v677_v35  ;;  %v408_v41 = vld [vmem:[%s1892_s27 + $0x8] sm:$0xff]  ;;  %v425_v44 = vld [vmem:[%s1900_s22 + $0x10] sm:$0xff]  ;;  %v1260_v45 = vpack.c.bf16 %v680_v40, %v679_v39  ;;  %v682_v47 = vld [vmem:[#allocation10 + $0x58] sm:$0xff] }
  0xc0   : > { %v424_v42 = vld [vmem:[%s1900_s22 + $0x8] sm:$0xff]  ;;  %v681_v46 = vld [vmem:[#allocation10 + $0x50] sm:$0xff]  ;;  %v441_v49 = vmul.f32 %v425_v44, %v409_v43  ;;  %v410_v50 = vld [vmem:[%s1892_s27 + $0x18] sm:$0xff]  ;;  %p1513_p1 = pnand %p1512_p10, %p1506_p6 }
  0xc1   : > { %1223 = vmatpush3.bf16.msra.mxu0 %v1220_v8  ;;  %v440_v48 = vmul.f32 %v424_v42, %v408_v41  ;;  %v426_v51 = vld [vmem:[%s1900_s22 + $0x18] sm:$0xff]  ;;  %v411_v52 = vld [vmem:[%s1892_s27 + $0x20] sm:$0xff]  ;;  %v1264_v54 = vpack.c.bf16 %v682_v47, %v681_v46  ;;  %v412_v57 = vld [vmem:[%s1892_s27 + $0x28] sm:$0xff] }
  0xc2   : > { %1225 = vmatprep.subr.bf16.mxu0 %v1224_v14  ;;  %1251 = vmatpush3.bf16.msra.mxu1 %v1248_v28  ;;  %v427_v53 = vld [vmem:[%s1900_s22 + $0x20] sm:$0xff]  ;;  %v442_v55 = vmul.f32 %v426_v51, %v410_v50  ;;  %v428_v58 = vld [vmem:[%s1900_s22 + $0x28] sm:$0xff]  ;;  %v413_v59 = vld [vmem:[%s1892_s27 + $0x30] sm:$0xff] }
  0xc3   : > { %1253 = vmatprep.subr.bf16.mxu1 %v1252_v33  ;;  %v443_v56 = vmul.f32 %v427_v53, %v411_v52  ;;  %v429_v60 = vld [vmem:[%s1900_s22 + $0x30] sm:$0xff]  ;;  %v444_v61 = vmul.f32 %v428_v58, %v412_v57  ;;  %v414_v63 = vld [vmem:[%s1892_s27 + $0x38] sm:$0xff]  ;;  %v415_v1 = vld [vmem:[%s1892_s27 + $0x40] sm:$0xff] }
  0xc4   : > { %v445_v62 = vmul.f32 %v429_v60, %v413_v59  ;;  %v430_v0 = vld [vmem:[%s1900_s22 + $0x38] sm:$0xff]  ;;  %v431_v2 = vld [vmem:[%s1900_s22 + $0x40] sm:$0xff]  ;;  %v416_v5 = vld [vmem:[%s1892_s27 + $0x48] sm:$0xff] }
  0xc5   : > { %1227 = vmatpush3.bf16.msra.mxu0 %v1224_v14  ;;  %v446_v3 = vmul.f32 %v430_v0, %v414_v63  ;;  %v447_v4 = vmul.f32 %v431_v2, %v415_v1  ;;  %v432_v6 = vld [vmem:[%s1900_s22 + $0x48] sm:$0xff]  ;;  %v417_v7 = vld [vmem:[%s1892_s27 + $0x50] sm:$0xff]  ;;  %v418_v11 = vld [vmem:[%s1892_s27 + $0x58] sm:$0xff] }
  0xc6   : > { %1229 = vmatprep.subr.bf16.mxu0 %v1228_v17  ;;  %1255 = vmatpush3.bf16.msra.mxu1 %v1252_v33  ;;  %v433_v8 = vld [vmem:[%s1900_s22 + $0x50] sm:$0xff]  ;;  %v448_v9 = vmul.f32 %v432_v6, %v416_v5  ;;  %v434_v12 = vld [vmem:[%s1900_s22 + $0x58] sm:$0xff]  ;;  %v419_v13 = vld [vmem:[%s1892_s27 + $0x60] sm:$0xff] }
  0xc7   : > { %1257 = vmatprep.subr.bf16.mxu1 %v1256_v38  ;;  %v449_v10 = vmul.f32 %v433_v8, %v417_v7  ;;  %v435_v14 = vld [vmem:[%s1900_s22 + $0x60] sm:$0xff]  ;;  %v450_v15 = vmul.f32 %v434_v12, %v418_v11  ;;  %v436_v18 = vld [vmem:[%s1900_s22 + $0x68] sm:$0xff]  ;;  %v421_v19 = vld [vmem:[%s1892_s27 + $0x70] sm:$0xff] }
  0xc8   : > { %v451_v16 = vmul.f32 %v435_v14, %v419_v13  ;;  %v437_v20 = vld [vmem:[%s1900_s22 + $0x70] sm:$0xff]  ;;  %v438_v24 = vld [vmem:[%s1900_s22 + $0x78] sm:$0xff]  ;;  %v683_v26 = vld [vmem:[#allocation10 + $0x60] sm:$0xff] }
  0xc9   : > { %1231 = vmatpush3.bf16.msra.mxu0 %v1228_v17  ;;  %v420_v17 = vld [vmem:[%s1892_s27 + $0x68] sm:$0xff]  ;;  %v453_v22 = vmul.f32 %v437_v20, %v421_v19  ;;  %v685_v29 = vld [vmem:[#allocation10 + $0x70] sm:$0xff]  ;;  %v686_v30 = vld [vmem:[#allocation10 + $0x78] sm:$0xff] }
  0xca   : > { %1233 = vmatprep.subr.bf16.mxu0 %v1232_v23  ;;  %1259 = vmatpush3.bf16.msra.mxu1 %v1256_v38  ;;  %v452_v21 = vmul.f32 %v436_v18, %v420_v17  ;;  %v684_v27 = vld [vmem:[#allocation10 + $0x68] sm:$0xff]  ;;  %v1948_v32 = vld [vmem:[%s2059_s4] ss:$0 sm:$0xff]  ;;  %v646_v5 = vld [vmem:[%s1907_s29 + $0x38] sm:$0xff] }
  0xcb   : > { %1261 = vmatprep.subr.bf16.mxu1 %v1260_v45  ;;  %v1268_v28 = vpack.c.bf16 %v684_v27, %v683_v26  ;;  %v639_v38 = vld [vmem:[%s1907_s29] sm:$0xff]  ;;  %v640_v39 = vld [vmem:[%s1907_s29 + $0x8] sm:$0xff] }
  0xcc   : > { %v643_v58 = vld [vmem:[%s1907_s29 + $0x20] sm:$0xff]  ;;  %v644_v59 = vld [vmem:[%s1907_s29 + $0x28] sm:$0xff] }
  0xcd   : > { %1235 = vmatpush3.bf16.msra.mxu0 %v1232_v23  ;;  %v422_v23 = vld [vmem:[%s1892_s27 + $0x78] sm:$0xff]  ;;  %v647_v14 = vld [vmem:[%s1907_s29 + $0x40] sm:$0xff] }
  0xce   : > { %1237 = vmatprep.subr.bf16.mxu0 %v1236_v31  ;;  %1263 = vmatpush3.bf16.msra.mxu1 %v1260_v45  ;;  %v454_v25 = vmul.f32 %v438_v24, %v422_v23  ;;  %v649_v24 = vld [vmem:[%s1907_s29 + $0x50] sm:$0xff] }
  0xcf   : > { %1265 = vmatprep.subr.bf16.mxu1 %v1264_v54 }
  0xd1   : > { %1239 = vmatpush3.bf16.msra.mxu0 %v1236_v31  ;;  %v1272_v31 = vpack.c.bf16 %v686_v30, %v685_v29 }
  0xd2   : > { %1241 = vmatprep.subr.bf16.mxu0 %v1240_v37  ;;  %1267 = vmatpush3.bf16.msra.mxu1 %v1264_v54 }
  0xd3   : > { %1269 = vmatprep.subr.bf16.mxu1 %v1268_v28 }
  0xd5   : > { %1243 = vmatpush3.bf16.msra.mxu0 %v1240_v37 }
  0xd6   : > { %1271 = vmatpush3.bf16.msra.mxu1 %v1268_v28 }
  0xd7   : > { %1273 = vmatprep.subr.bf16.mxu1 %v1272_v31 }
  0xd8   : > { %1133 = vmatmul.mubr.f32.vlgmr.msra.gmra.mrb[0].mxu0 %v440_v48  ;;  %v641_v48 = vld [vmem:[%s1907_s29 + $0x10] sm:$0xff] }
  0xd9   : > { %1135 = vmatprep.mubr.f32.mxu0 %v441_v49  ;;  %v642_v49 = vld [vmem:[%s1907_s29 + $0x18] sm:$0xff] }
  0xda   : > { %1275 = vmatpush3.bf16.msra.mxu1 %v1272_v31 }
  0xdc   : > { %1136 = vmatmul.mubr.f32.gmra.mrb[2].mxu0 %v442_v55 }
  0xdd   : > { %1138 = vmatprep.mubr.f32.mxu0 %v443_v56 }
  0xe0   : > { %1139 = vmatmul.mubr.f32.gmra.mrb[4].mxu0 %v444_v61 }
  0xe1   : > { %1141 = vmatprep.mubr.f32.mxu0 %v445_v62 }
  0xe4   : > { %1142 = vmatmul.mubr.f32.gmra.mrb[6].mxu0 %v446_v3 }
  0xe5   : > { %1144 = vmatprep.mubr.f32.mxu0 %v447_v4  ;;  %v645_v4 = vld [vmem:[%s1907_s29 + $0x30] sm:$0xff] }
  0xe8   : > { %1145 = vmatmul.mubr.f32.gmra.mrb[8].mxu0 %v448_v9 }
  0xe9   : > { %1147 = vmatprep.mubr.f32.mxu0 %v449_v10 }
  0xec   : > { %1148 = vmatmul.mubr.f32.gmra.mrb[10].mxu0 %v450_v15  ;;  %v648_v15 = vld [vmem:[%s1907_s29 + $0x48] sm:$0xff] }
  0xed   : > { %1150 = vmatprep.mubr.f32.mxu0 %v451_v16 }
  0xf0   : > { %1151 = vmatmul.mubr.f32.gmra.mrb[12].mxu0 %v452_v21 }
  0xf1   : > { %1153 = vmatprep.mubr.f32.mxu0 %v453_v22 }
  0xf4   : > { %1154 = vmatmul.mubr.f32.gmra.mrb[14].mxu0 %v454_v25  ;;  %v650_v25 = vld [vmem:[%s1907_s29 + $0x58] sm:$0xff] }
 0x1ab   : > { %v1134_v33 = vpop.f32.mrb[0].mxu0 }
 0x1ac   : > { %v550_v34 = vadd.f32 %v1134_v33, %v1948_v32  ;;  %v544_v35 = vpop.f32.mrb[1].mxu0 }
 0x1ad   : > { %v545_v36 = vadd.f32 %v1948_v32, %v544_v35  ;;  %v651_v35 = vld [vmem:[%s1907_s29 + $0x60] sm:$0xff] }
 0x1ae   : > { %v624_v37 = vmax.f32 %v550_v34, 0.0 }
 0x1af   : > { %v623_v40 = vmax.f32 %v545_v36, 0.0  ;;  %v1137_v41 = vpop.f32.mrb[2].mxu0  ;;  %v652_v36 = vld [vmem:[%s1907_s29 + $0x68] sm:$0xff] }
 0x1b0   : > { %v560_v42 = vadd.f32 %v1137_v41, %v1948_v32  ;;  %v554_v43 = vpop.f32.mrb[3].mxu0  ;;  %v656_v46 = vmul.f32 %v640_v39, %v624_v37 }
 0x1b1   : > { %v555_v44 = vadd.f32 %v1948_v32, %v554_v43  ;;  %v655_v45 = vmul.f32 %v639_v38, %v623_v40 }
 0x1b2   : > { %v626_v47 = vmax.f32 %v560_v42, 0.0 }
 0x1b3   : > { %v625_v50 = vmax.f32 %v555_v44, 0.0  ;;  %v1140_v51 = vpop.f32.mrb[4].mxu0  ;;  %1188 = vmatprep.mubr.f32.mxu1 %v655_v45  ;;  %v653_v45 = vld [vmem:[%s1907_s29 + $0x70] sm:$0xff] }
 0x1b4   : > { %v570_v52 = vadd.f32 %v1140_v51, %v1948_v32  ;;  %v564_v53 = vpop.f32.mrb[5].mxu0  ;;  %1189 = vmatmul.mubr.f32.vlgmr.msra.gmra.mrb[0].mxu1 %v656_v46  ;;  %v658_v56 = vmul.f32 %v642_v49, %v626_v47  ;;  %v654_v46 = vld [vmem:[%s1907_s29 + $0x78] sm:$0xff] }
 0x1b5   : > { %v657_v54 = vmul.f32 %v641_v48, %v625_v50  ;;  %v565_v55 = vadd.f32 %v1948_v32, %v564_v53  ;;  %v1026_v50 = vld [vmem:[%s2061_s6] ss:$0 sm:$0xff] }
 0x1b6   : > { %v628_v57 = vmax.f32 %v570_v52, 0.0 }
 0x1b7   : > { %v627_v60 = vmax.f32 %v565_v55, 0.0  ;;  %v1143_v61 = vpop.f32.mrb[6].mxu0  ;;  %1191 = vmatprep.mubr.f32.mxu1 %v657_v54 }
 0x1b8   : > { %v580_v62 = vadd.f32 %v1143_v61, %v1948_v32  ;;  %v574_v63 = vpop.f32.mrb[7].mxu0  ;;  %1192 = vmatmul.mubr.f32.gmra.mrb[2].mxu1 %v658_v56  ;;  %v660_v2 = vmul.f32 %v644_v59, %v628_v57 }
 0x1b9   : > { %v659_v0 = vmul.f32 %v643_v58, %v627_v60  ;;  %v575_v1 = vadd.f32 %v1948_v32, %v574_v63 }
 0x1ba   : > { %v630_v3 = vmax.f32 %v580_v62, 0.0 }
 0x1bb   : > { %v629_v6 = vmax.f32 %v575_v1, 0.0  ;;  %v1146_v7 = vpop.f32.mrb[8].mxu0  ;;  %1194 = vmatprep.mubr.f32.mxu1 %v659_v0 }
 0x1bc   : > { %v590_v8 = vadd.f32 %v1146_v7, %v1948_v32  ;;  %v584_v9 = vpop.f32.mrb[9].mxu0  ;;  %1195 = vmatmul.mubr.f32.gmra.mrb[4].mxu1 %v660_v2  ;;  %v662_v12 = vmul.f32 %v646_v5, %v630_v3 }
 0x1bd   : > { %v661_v10 = vmul.f32 %v645_v4, %v629_v6  ;;  %v585_v11 = vadd.f32 %v1948_v32, %v584_v9 }
 0x1be   : > { %v632_v13 = vmax.f32 %v590_v8, 0.0 }
 0x1bf   : > { %v631_v16 = vmax.f32 %v585_v11, 0.0  ;;  %v1149_v17 = vpop.f32.mrb[10].mxu0  ;;  %1197 = vmatprep.mubr.f32.mxu1 %v661_v10 }
 0x1c0   : > { %v600_v18 = vadd.f32 %v1149_v17, %v1948_v32  ;;  %v594_v19 = vpop.f32.mrb[11].mxu0  ;;  %1198 = vmatmul.mubr.f32.gmra.mrb[6].mxu1 %v662_v12  ;;  %v664_v22 = vmul.f32 %v648_v15, %v632_v13 }
 0x1c1   : > { %v663_v20 = vmul.f32 %v647_v14, %v631_v16  ;;  %v595_v21 = vadd.f32 %v1948_v32, %v594_v19 }
 0x1c2   : > { %v634_v23 = vmax.f32 %v600_v18, 0.0 }
 0x1c3   : > { %v633_v26 = vmax.f32 %v595_v21, 0.0  ;;  %v1152_v27 = vpop.f32.mrb[12].mxu0  ;;  %1200 = vmatprep.mubr.f32.mxu1 %v663_v20 }
 0x1c4   : > { %v610_v28 = vadd.f32 %v1152_v27, %v1948_v32  ;;  %v604_v29 = vpop.f32.mrb[13].mxu0  ;;  %1201 = vmatmul.mubr.f32.gmra.mrb[8].mxu1 %v664_v22  ;;  %v666_v33 = vmul.f32 %v650_v25, %v634_v23 }
 0x1c5   : > { %v665_v30 = vmul.f32 %v649_v24, %v633_v26  ;;  %v605_v31 = vadd.f32 %v1948_v32, %v604_v29 }
 0x1c6   : > { %v636_v34 = vmax.f32 %v610_v28, 0.0 }
 0x1c7   : > { %v635_v37 = vmax.f32 %v605_v31, 0.0  ;;  %v1155_v38 = vpop.f32.mrb[14].mxu0  ;;  %1203 = vmatprep.mubr.f32.mxu1 %v665_v30 }
 0x1c8   : > { %v620_v39 = vadd.f32 %v1155_v38, %v1948_v32  ;;  %v614_v40 = vpop.f32.mrb[15].mxu0  ;;  %1204 = vmatmul.mubr.f32.gmra.mrb[10].mxu1 %v666_v33  ;;  %v668_v43 = vmul.f32 %v652_v36, %v636_v34 }
 0x1c9   : > { %v667_v41 = vmul.f32 %v651_v35, %v635_v37  ;;  %v615_v42 = vadd.f32 %v1948_v32, %v614_v40 }
 0x1ca   : > { %v638_v44 = vmax.f32 %v620_v39, 0.0 }
 0x1cb   : > { %v637_v47 = vmax.f32 %v615_v42, 0.0  ;;  %1206 = vmatprep.mubr.f32.mxu1 %v667_v41 }
 0x1cc   : > { %1207 = vmatmul.mubr.f32.gmra.mrb[12].mxu1 %v668_v43  ;;  %v670_v49 = vmul.f32 %v654_v46, %v638_v44 }
 0x1cd   : > { %v669_v48 = vmul.f32 %v653_v45, %v637_v47 }
 0x1cf   : > { %1209 = vmatprep.mubr.f32.mxu1 %v669_v48 }
 0x1d0   : > { %1210 = vmatmul.mubr.f32.gmra.mrb[14].mxu1 %v670_v49 }
 0x287   : > { %v1190_v51 = vpop.f32.mrb[0].mxu1 }
 0x288   : > { %v766_v52 = vadd.f32 %v1190_v51, %v1026_v50  ;;  %v760_v53 = vpop.f32.mrb[1].mxu1 }
 0x289   : > { %v761_v32 = vadd.f32 %v1026_v50, %v760_v53 }
 0x28a   : > { %840 = vst [vmem:[%s1986_s18 + $0x8] sm:$0xff] %v766_v52 }
 0x28b   : > { %839 = vst [vmem:[%s1986_s18] sm:$0xff] %v761_v32  ;;  %v1193_v54 = vpop.f32.mrb[2].mxu1 }
 0x28c   : > { %v776_v55 = vadd.f32 %v1193_v54, %v1026_v50  ;;  %v770_v56 = vpop.f32.mrb[3].mxu1 }
 0x28d   : > { %v771_v57 = vadd.f32 %v1026_v50, %v770_v56 }
 0x28e   : > { %842 = vst [vmem:[%s1986_s18 + $0x18] sm:$0xff] %v776_v55 }
 0x28f   : > { %841 = vst [vmem:[%s1986_s18 + $0x10] sm:$0xff] %v771_v57  ;;  %v1196_v58 = vpop.f32.mrb[4].mxu1 }
 0x290   : > { %v786_v59 = vadd.f32 %v1196_v58, %v1026_v50  ;;  %v780_v60 = vpop.f32.mrb[5].mxu1 }
 0x291   : > { %v781_v61 = vadd.f32 %v1026_v50, %v780_v60 }
 0x292   : > { %844 = vst [vmem:[%s1986_s18 + $0x28] sm:$0xff] %v786_v59 }
 0x293   : > { %843 = vst [vmem:[%s1986_s18 + $0x20] sm:$0xff] %v781_v61  ;;  %v1199_v62 = vpop.f32.mrb[6].mxu1 }
 0x294   : > { %v796_v63 = vadd.f32 %v1199_v62, %v1026_v50  ;;  %v790_v0 = vpop.f32.mrb[7].mxu1 }
 0x295   : > { %v791_v1 = vadd.f32 %v1026_v50, %v790_v0 }
 0x296   : > { %846 = vst [vmem:[%s1986_s18 + $0x38] sm:$0xff] %v796_v63 }
 0x297   : > { %845 = vst [vmem:[%s1986_s18 + $0x30] sm:$0xff] %v791_v1  ;;  %v1202_v2 = vpop.f32.mrb[8].mxu1 }
 0x298   : > { %v806_v3 = vadd.f32 %v1202_v2, %v1026_v50  ;;  %v800_v4 = vpop.f32.mrb[9].mxu1 }
 0x299   : > { %v801_v5 = vadd.f32 %v1026_v50, %v800_v4 }
 0x29a   : > { %848 = vst [vmem:[%s1986_s18 + $0x48] sm:$0xff] %v806_v3 }
 0x29b   : > { %847 = vst [vmem:[%s1986_s18 + $0x40] sm:$0xff] %v801_v5  ;;  %v1205_v6 = vpop.f32.mrb[10].mxu1 }
 0x29c   : > { %v816_v7 = vadd.f32 %v1205_v6, %v1026_v50  ;;  %v810_v8 = vpop.f32.mrb[11].mxu1 }
 0x29d   : > { %v811_v9 = vadd.f32 %v1026_v50, %v810_v8 }
 0x29e   : > { %850 = vst [vmem:[%s1986_s18 + $0x58] sm:$0xff] %v816_v7 }
 0x29f   : > { %849 = vst [vmem:[%s1986_s18 + $0x50] sm:$0xff] %v811_v9  ;;  %v1208_v10 = vpop.f32.mrb[12].mxu1 }
 0x2a0   : > { %v826_v11 = vadd.f32 %v1208_v10, %v1026_v50  ;;  %v820_v12 = vpop.f32.mrb[13].mxu1 }
 0x2a1   : > { %v821_v13 = vadd.f32 %v1026_v50, %v820_v12 }
 0x2a2   : > { %852 = vst [vmem:[%s1986_s18 + $0x68] sm:$0xff] %v826_v11 }
 0x2a3   : > { %851 = vst [vmem:[%s1986_s18 + $0x60] sm:$0xff] %v821_v13  ;;  %v1211_v14 = vpop.f32.mrb[14].mxu1 }
 0x2a4   : > { %v836_v15 = vadd.f32 %v1211_v14, %v1026_v50  ;;  %v830_v16 = vpop.f32.mrb[15].mxu1 }
 0x2a5   : > { %v831_v17 = vadd.f32 %v1026_v50, %v830_v16 }
 0x2a6   : > { %854 = vst [vmem:[%s1986_s18 + $0x78] sm:$0xff] %v836_v15 }
 0x2a7   : > { %853 = vst [vmem:[%s1986_s18 + $0x70] sm:$0xff] %v831_v17 }
 0x2a8   : > { %1516 = shalt.err (!%p1513_p1)
}
 0x2a9   : > { %s1517_s8 = scalar_lea.hbm %s2007_s20, 2048  ;;  %s1521_s11 = scalar_lea.hbm %s2062_s7, 4096 }
 0x2aa   : > { %p1518_p5 = scmp.ne.s32.totalorder %s2007_s20, %s1517_s8  ;;  %p1522_p4 = scmp.lt.u32.totalorder %s2007_s20, %s2062_s7 }
 0x2ab   : > { %p1523_p8 = scmp.lt.u32.totalorder %s1521_s11, %s1517_s8  ;;  %p1525_p3 = scmp.lt.u32.totalorder %s1517_s8, %s2007_s20 }
 0x2ac   : > { %p1519_p11 = pnand %p1518_p5, %p2115_p7 }
 0x2ad   : > { %p1524_p13 = por %p1523_p8, %p1522_p4 }
 0x2ae   : > { %p1520_p12 = pneg %p1519_p11 }
 0x2af   : > { %p1526_p0 = por %p1525_p3, %p1524_p13 }
 0x2b1   : > { %p1527_p6 = pnand %p1526_p0, %p1520_p12 }
 0x2b3   : > { %1530 = shalt.err (!%p1527_p6)
}
 0x2b4   : > { %s1587_s12 = smov 128   ;;  %s1588_s24 = smov 8  }
 0x2b5   : > { %1290 = dma.vmem_to_hbm [thread:$0]  (%p2115_p7), %s2009_s10, 2048, %s2007_s20, %s856_s28, %s1587_s12, %s1587_s12, %s1588_s24  }
 0x2b6 PF: > { %s2116_s14 = sld [smem:[#allocation16_spill]]  ;;  %s2117_s23 = sld [smem:[#allocation20_spill]] }
 0x2b7   : > { %s2118_s18 = sld [smem:[#allocation17_spill]] }
 0x2bc   : > { %s884_s17 = sand.u32 1, %s2116_s14   ;;  %p2119_p2 = scmp.ne.s32.totalorder %s2117_s23, 0 }
 0x2bd   : > { %p2120_p9 = scmp.ge.s32.totalorder %s2118_s18, 2  ;;  %s885_s16 = scalar_lea.sflag [#allocation4], %s884_s17 }
 0x2bf   : > { %p1310_p10 = pnand %p2120_p9, %p2119_p2 }
 0x2c1   : > { %1560 = dma.done.wait (!%p1310_p10), %s885_s16, 2048  }
 0x2c2   : > { %1562 = vsyncadd (!%p1310_p10), %s885_s16, 4294965248  ;;  %s2121_s27 = sld [smem:[#allocation18_spill]]  ;;  %s2122_s19 = sld [smem:[#allocation19_spill]] }
 0x2c3   : > { %s2123_s24 = smov %s1569_s25  ;;  %s2124_s25 = smov %s1573_s26 }
 0x2c8   : > { %p24_p1 = scmp.ge.s32.totalorder %s2121_s27, 4   ;;  %s2125_s26 = smov %s2122_s19 }
 0x2ca   :  { %26 = sbr.rel (!%p24_p1) target bundleno = 11 (0xb), region = 125 }
 0x2d1   :  { %890 = vsyncpa [#allocation3], 1 }
 0x2d2   :  { %892 = vsyncpa [#allocation3 + $0x1], 1 }
 0x2d3   :  { %893 = vsyncpa [#allocation6], 1 }
 0x2d4   :  { %895 = vsyncpa [#allocation6 + $0x1], 1 }
 0x2d5   :  { %896 = vsyncpa [#allocation9], 1 }
 0x2d6   :  { %897 = vsyncpa [#allocation4], 1 }
 0x2d7   :  { %899 = vsyncpa [#allocation4 + $0x1], 1 }

</bundles_post_ra>
